<compile_context>
chip_gen: v5e
topology: v5e:2x2
jax: 0.10.0
libtpu: 0.0.40
codegen_flags: <defaults>
</compile_context>

<pallas_src>
import jax
import jax.numpy as jnp
import numpy as np
from jax.experimental import pallas as pl
from jax.experimental.pallas import tpu as pltpu


def _round_up(a, b):
    return ((a + b - 1) // b) * b


def _tensorcores_per_chip():
    """Best-effort detection of multi-TensorCore (megacore) chips."""
    try:
        kind = jax.devices()[0].device_kind.lower().replace(" ", "")
    except Exception:
        return 1
    return 2 if any(t in kind for t in ("v7", "tpu7", "v4", "v5p")) else 1


# ----------------------------------------------------------------------------
# Pallas kernel: fused encoder MLP on one (tg, 2*G) tile of G-packed tokens.
# ----------------------------------------------------------------------------
def enc_mlp_kernel(x_ref, w12_ref, wst_ref, bst_ref, o_ref):
    """x_ref   : (tg, 2*G)     packed tokens (G tokens/row, features interleaved)
       w12_ref : (2*G, G*H)    block-diagonal folded Linear(2,H).Linear(H,H)
       wst_ref : (2, G*H, G*H) block-diagonal w3, w4
       bst_ref : (3, G*H)      tiled b12, b3, b4
       o_ref   : (tg, G*H)
    """
    x = x_ref[...]
    ncols = x.shape[1]

    # Folded first two linears: a K=2*G contraction wastes the MXU, so do it
    # as rank-1 VPU broadcast multiply-adds (statically unrolled).
    acc = bst_ref[0:1, :]
    for c in range(ncols):
        acc = acc + x[:, c:c + 1] * w12_ref[c:c + 1, :]
    h = jnp.maximum(acc, 0.0)                                 # ReLU

    # Linear(H,H) + ReLU, then final Linear(H,H) -- MXU, block-diagonal packed,
    # f32 accumulation (weights may be bf16 if prepared with mxu_dtype=bf16).
    wdt = wst_ref.dtype
    h = jnp.dot(h.astype(wdt), wst_ref[0], preferred_element_type=jnp.float32)
    h = jnp.maximum(h + bst_ref[1:2, :], 0.0)
    h = jnp.dot(h.astype(wdt), wst_ref[1], preferred_element_type=jnp.float32)
    h = h + bst_ref[2:3, :]

    o_ref[...] = h.astype(o_ref.dtype)


# ----------------------------------------------------------------------------
# One-time parameter preparation (hoisted out of the forward call)
# ----------------------------------------------------------------------------
def prepare_enc_params(params, *, pack=2, mxu_dtype=jnp.float32):
    """Fold Linear(2,H).Linear(H,H) (exact: no activation between them) and
    build block-diagonal copies so `pack` tokens share one lane-dense row."""
    (w1, b1), (w2, b2), (w3, b3), (w4, b4) = params
    w12 = (w1 @ w2).astype(jnp.float32)                       # (2, H)
    b12 = (b1 @ w2 + b2).astype(jnp.float32)                  # (H,)
    G = int(pack)
    eye = jnp.eye(G, dtype=jnp.float32)
    w12p = jnp.kron(eye, w12)                                 # (2G, G*H)
    w_stack = jnp.stack([jnp.kron(eye, w3.astype(jnp.float32)),
                         jnp.kron(eye, w4.astype(jnp.float32))]).astype(mxu_dtype)
    b_stack = jnp.stack([jnp.tile(b12, G),
                         jnp.tile(b3.astype(jnp.float32), G),
                         jnp.tile(b4.astype(jnp.float32), G)])  # (3, G*H)
    return dict(pack=G, hidden=int(w1.shape[1]), w12=w12p, w=w_stack, b=b_stack)


# ----------------------------------------------------------------------------
# pallas_call wrapper: (M, 2) tokens -> (M, H)
# ----------------------------------------------------------------------------
def enc_mlp_pallas(x_flat, prep, *, tm_tokens=4096, out_dtype=jnp.float32):
    M, Fin = x_flat.shape
    G, H = prep["pack"], prep["hidden"]
    GH = G * H
    assert M % G == 0, (M, G)
    Mg = M // G

    # Free (bitcast) reshape: G tokens per packed row, features interleaved.
    x_p = x_flat.reshape(Mg, G * Fin).astype(jnp.float32)

    # Tile choice: big tiles to amortize per-step overhead; keep >= 4 steps on
    # 2-TC chips (megacore + double buffering); single-TC chips may run a
    # single step for small M.  No padding: the ragged last block is masked.
    n_tc = _tensorcores_per_chip()
    min_steps = 4 if n_tc > 1 else 1
    tg_target = max(8, _round_up(max(1, tm_tokens // G), 8))
    tg_cap = max(8, _round_up(pl.cdiv(Mg, min_steps), 8))
    tg = min(tg_target, tg_cap)
    grid = (pl.cdiv(Mg, tg),)

    def const_spec(shape):
        nd = len(shape)
        return pl.BlockSpec(shape, lambda i, _nd=nd: (0,) * _nd)

    grid_spec = pltpu.PrefetchScalarGridSpec(
        num_scalar_prefetch=0,
        grid=grid,
        in_specs=[
            pl.BlockSpec((tg, G * Fin), lambda i: (i, 0)),    # packed token tile
            const_spec(prep["w12"].shape),                    # (2G, GH)
            const_spec(prep["w"].shape),                      # (2, GH, GH)
            const_spec(prep["b"].shape),                      # (3, GH)
        ],
        out_specs=pl.BlockSpec((tg, GH), lambda i: (i, 0)),   # lane-dense output
    )
    out_p = pl.pallas_call(
        enc_mlp_kernel,
        out_shape=jax.ShapeDtypeStruct((Mg, GH), out_dtype),
        grid_spec=grid_spec,
        compiler_params=pltpu.CompilerParams(
            dimension_semantics=("parallel",),
            # ~4 MiB actually used at tm_tokens=4096; explicit budget keeps
            # larger tiles safe on v7x (32 MiB scoped / 64 MiB physical VMEM).
            vmem_limit_bytes=32 * 1024 * 1024,
        ),
    )(x_p, prep["w12"], prep["w"], prep["b"])

    return out_p.reshape(M, H)                                # free bitcast


# ----------------------------------------------------------------------------
# Wrapper reproducing SmallDeepSet.forward
# ----------------------------------------------------------------------------
def small_deep_set_forward(x, params=None, *, prepared=None, tm_tokens=4096,
                           out_dtype=jnp.float32):
    """x: (B, J, N, 2) -> (B, J*N, H)  (or (B, N, H) when J == 1)."""
    B, J, N, Fin = x.shape
    M = B * J * N
    if prepared is None or M % prepared["pack"] != 0:
        assert params is not None, "need raw params to prepare"
        prepared = prepare_enc_params(params, pack=2 if M % 2 == 0 else 1)
    H = prepared["hidden"]
    x_flat = x.reshape(M, Fin)
    out_flat = enc_mlp_pallas(x_flat, prepared, tm_tokens=tm_tokens,
                              out_dtype=out_dtype)
    # Row order b*J*N + j*N + n  <=>  torch.cat over j along dim 1.
    if J > 1:
        return out_flat.reshape(B, J * N, H)
    return out_flat.reshape(B, N, H)


# ----------------------------------------------------------------------------
# Deterministic parameter init (PyTorch-like uniform(-1/sqrt(fan_in), ..))
# ----------------------------------------------------------------------------
def init_params(key, n_hidden_units=64):
    dims = [(2, n_hidden_units),
            (n_hidden_units, n_hidden_units),
            (n_hidden_units, n_hidden_units),
            (n_hidden_units, n_hidden_units)]
    params = []
    for (fan_in, fan_out) in dims:
        key, kw, kb = jax.random.split(key, 3)
        bound = 1.0 / np.sqrt(fan_in)
        w = jax.random.uniform(kw, (fan_in, fan_out), jnp.float32, -bound, bound)
        b = jax.random.uniform(kb, (fan_out,), jnp.float32, -bound, bound)
        params.append((w, b))
    return params
    # TODO(synk): `dec` (Linear(H, n_outputs)) exists in __init__ but is never
    # invoked by forward(), so it is intentionally not materialized here.


def reference_forward(x, params):
    (w1, b1), (w2, b2), (w3, b3), (w4, b4) = params
    h = x @ w1 + b1
    h = h @ w2 + b2
    h = jnp.maximum(h, 0.0)
    h = h @ w3 + b3
    h = jnp.maximum(h, 0.0)
    h = h @ w4 + b4
    B, J, N, H = h.shape
    return h.reshape(B, J * N, H)


if __name__ == "__main__":
    key = jax.random.PRNGKey(0)
    key, kx = jax.random.split(key)

    B, J, N, Fin, H = 2, 4, 16, 2, 64        # M = B*J*N = 128 tokens
    x = jax.random.normal(kx, (B, J, N, Fin), dtype=jnp.float32)
    params = init_params(key, n_hidden_units=H)

    # One-time parameter preparation (fold + block-diagonal packing).
    prep = prepare_enc_params(params, pack=2)

    out = small_deep_set_forward(x, params, prepared=prep)
    out = jax.block_until_ready(out)

    ref = reference_forward(x, params)
    assert out.shape == (B, J * N, H), out.shape
    # folding (w1 @ w2) reorders f32 rounding slightly -> slightly relaxed tol
    np.testing.assert_allclose(np.asarray(out), np.asarray(ref),
                               rtol=2e-5, atol=2e-5)
    print("KERNEL_OK")
</pallas_src>

<mosaic_0001>
module attributes {stable_mosaic.version = 11 : i64} {
  func.func @enc_mlp_kernel(%arg0: i32, %arg1: memref<64x4xf32, #tpu.memory_space<vmem>>, %arg2: memref<4x128xf32, #tpu.memory_space<vmem>>, %arg3: memref<2x128x128xf32, #tpu.memory_space<vmem>>, %arg4: memref<3x128xf32, #tpu.memory_space<vmem>>, %arg5: memref<64x128xf32, #tpu.memory_space<vmem>>) attributes {dimension_semantics = [#tpu.dimension_semantics<parallel>], iteration_bounds = array<i64: 1>, scalar_prefetch = 0 : i64, scratch_operands = 0 : i64, tpu.core_type = #tpu.core_type<tc>, window_params = [{transform_indices = @transform_0, window_bounds = array<i64: 64, 4>}, {pipeline_mode = #tpu.pipeline_mode<synchronous>, transform_indices = @transform_1, window_bounds = array<i64: 4, 128>}, {pipeline_mode = #tpu.pipeline_mode<synchronous>, transform_indices = @transform_2, window_bounds = array<i64: 2, 128, 128>}, {pipeline_mode = #tpu.pipeline_mode<synchronous>, transform_indices = @transform_3, window_bounds = array<i64: 3, 128>}, {transform_indices = @transform_4, window_bounds = array<i64: 64, 128>}]} {
    %c0 = arith.constant 0 : index
    %c0_0 = arith.constant 0 : index
    %0 = vector.load %arg1[%c0, %c0_0] : memref<64x4xf32, #tpu.memory_space<vmem>>, vector<64x4xf32>
    %c0_1 = arith.constant 0 : index
    %c0_2 = arith.constant 0 : index
    %1 = vector.load %arg4[%c0_1, %c0_2] : memref<3x128xf32, #tpu.memory_space<vmem>>, vector<1x128xf32>
    %2 = vector.extract_strided_slice %0 {offsets = [0, 0], sizes = [64, 1], strides = [1, 1]} : vector<64x4xf32> to vector<64x1xf32>
    %c0_3 = arith.constant 0 : index
    %c0_4 = arith.constant 0 : index
    %3 = vector.load %arg2[%c0_3, %c0_4] : memref<4x128xf32, #tpu.memory_space<vmem>>, vector<1x128xf32>
    %4 = vector.broadcast %2 : vector<64x1xf32> to vector<64x128xf32>
    %5 = vector.broadcast %3 : vector<1x128xf32> to vector<64x128xf32>
    %6 = arith.mulf %4, %5 : vector<64x128xf32>
    %7 = vector.broadcast %1 : vector<1x128xf32> to vector<64x128xf32>
    %8 = arith.addf %7, %6 : vector<64x128xf32>
    %9 = vector.extract_strided_slice %0 {offsets = [0, 1], sizes = [64, 1], strides = [1, 1]} : vector<64x4xf32> to vector<64x1xf32>
    %c1 = arith.constant 1 : index
    %c0_5 = arith.constant 0 : index
    %10 = vector.load %arg2[%c1, %c0_5] : memref<4x128xf32, #tpu.memory_space<vmem>>, vector<1x128xf32>
    %11 = vector.broadcast %9 : vector<64x1xf32> to vector<64x128xf32>
    %12 = vector.broadcast %10 : vector<1x128xf32> to vector<64x128xf32>
    %13 = arith.mulf %11, %12 : vector<64x128xf32>
    %14 = arith.addf %8, %13 : vector<64x128xf32>
    %15 = vector.extract_strided_slice %0 {offsets = [0, 2], sizes = [64, 1], strides = [1, 1]} : vector<64x4xf32> to vector<64x1xf32>
    %c2 = arith.constant 2 : index
    %c0_6 = arith.constant 0 : index
    %16 = vector.load %arg2[%c2, %c0_6] : memref<4x128xf32, #tpu.memory_space<vmem>>, vector<1x128xf32>
    %17 = vector.broadcast %15 : vector<64x1xf32> to vector<64x128xf32>
    %18 = vector.broadcast %16 : vector<1x128xf32> to vector<64x128xf32>
    %19 = arith.mulf %17, %18 : vector<64x128xf32>
    %20 = arith.addf %14, %19 : vector<64x128xf32>
    %21 = vector.extract_strided_slice %0 {offsets = [0, 3], sizes = [64, 1], strides = [1, 1]} : vector<64x4xf32> to vector<64x1xf32>
    %c3 = arith.constant 3 : index
    %c0_7 = arith.constant 0 : index
    %22 = vector.load %arg2[%c3, %c0_7] : memref<4x128xf32, #tpu.memory_space<vmem>>, vector<1x128xf32>
    %23 = vector.broadcast %21 : vector<64x1xf32> to vector<64x128xf32>
    %24 = vector.broadcast %22 : vector<1x128xf32> to vector<64x128xf32>
    %25 = arith.mulf %23, %24 : vector<64x128xf32>
    %26 = arith.addf %20, %25 : vector<64x128xf32>
    %cst = arith.constant 0.000000e+00 : f32
    %27 = vector.broadcast %cst : f32 to vector<64x128xf32>
    %28 = arith.maximumf %26, %27 : vector<64x128xf32>
    %c0_8 = arith.constant 0 : index
    %c0_9 = arith.constant 0 : index
    %c0_10 = arith.constant 0 : index
    %29 = vector.load %arg3[%c0_8, %c0_9, %c0_10] : memref<2x128x128xf32, #tpu.memory_space<vmem>>, vector<1x128x128xf32>
    %30 = vector.shape_cast %29 : vector<1x128x128xf32> to vector<128x128xf32>
    %cst_11 = arith.constant dense<0.000000e+00> : vector<64x128xf32>
    %31 = tpu.matmul %28, %30, %cst_11 {dimension_numbers = #tpu.dot_dimension_numbers<[1], [0], [0], [1], [0, 0, 1, 1], [], []>} : vector<64x128xf32>, vector<128x128xf32>, vector<64x128xf32> -> vector<64x128xf32>
    %c1_12 = arith.constant 1 : index
    %c0_13 = arith.constant 0 : index
    %32 = vector.load %arg4[%c1_12, %c0_13] : memref<3x128xf32, #tpu.memory_space<vmem>>, vector<1x128xf32>
    %33 = vector.broadcast %32 : vector<1x128xf32> to vector<64x128xf32>
    %34 = arith.addf %31, %33 : vector<64x128xf32>
    %cst_14 = arith.constant 0.000000e+00 : f32
    %35 = vector.broadcast %cst_14 : f32 to vector<64x128xf32>
    %36 = arith.maximumf %34, %35 : vector<64x128xf32>
    %c1_15 = arith.constant 1 : index
    %c0_16 = arith.constant 0 : index
    %c0_17 = arith.constant 0 : index
    %37 = vector.load %arg3[%c1_15, %c0_16, %c0_17] : memref<2x128x128xf32, #tpu.memory_space<vmem>>, vector<1x128x128xf32>
    %38 = vector.shape_cast %37 : vector<1x128x128xf32> to vector<128x128xf32>
    %cst_18 = arith.constant dense<0.000000e+00> : vector<64x128xf32>
    %39 = tpu.matmul %36, %38, %cst_18 {dimension_numbers = #tpu.dot_dimension_numbers<[1], [0], [0], [1], [0, 0, 1, 1], [], []>} : vector<64x128xf32>, vector<128x128xf32>, vector<64x128xf32> -> vector<64x128xf32>
    %c2_19 = arith.constant 2 : index
    %c0_20 = arith.constant 0 : index
    %40 = vector.load %arg4[%c2_19, %c0_20] : memref<3x128xf32, #tpu.memory_space<vmem>>, vector<1x128xf32>
    %41 = vector.broadcast %40 : vector<1x128xf32> to vector<64x128xf32>
    %42 = arith.addf %39, %41 : vector<64x128xf32>
    %c0_21 = arith.constant 0 : index
    %c0_22 = arith.constant 0 : index
    %43 = vector.load %arg5[%c0_21, %c0_22] : memref<64x128xf32, #tpu.memory_space<vmem>>, vector<64x128xf32>
    tpu.vector_store %arg5[%c0_21, %c0_22], %42 {strides = array<i32>} : memref<64x128xf32, #tpu.memory_space<vmem>>, vector<64x128xf32>,
    return
  }
  func.func @transform_0(%arg0: i32) -> (i32, i32) {
    %c0_i32 = arith.constant 0 : i32
    %c0_i32_0 = arith.constant 0 : i32
    return %arg0, %c0_i32 : i32, i32
  }
  func.func @transform_1(%arg0: i32) -> (i32, i32) {
    %c0_i32 = arith.constant 0 : i32
    %c0_i32_0 = arith.constant 0 : i32
    %c0_i32_1 = arith.constant 0 : i32
    return %c0_i32, %c0_i32_0 : i32, i32
  }
  func.func @transform_2(%arg0: i32) -> (i32, i32, i32) {
    %c0_i32 = arith.constant 0 : i32
    %c0_i32_0 = arith.constant 0 : i32
    %c0_i32_1 = arith.constant 0 : i32
    %c0_i32_2 = arith.constant 0 : i32
    return %c0_i32, %c0_i32_0, %c0_i32_1 : i32, i32, i32
  }
  func.func @transform_3(%arg0: i32) -> (i32, i32) {
    %c0_i32 = arith.constant 0 : i32
    %c0_i32_0 = arith.constant 0 : i32
    %c0_i32_1 = arith.constant 0 : i32
    return %c0_i32, %c0_i32_0 : i32, i32
  }
  func.func @transform_4(%arg0: i32) -> (i32, i32) {
    %c0_i32 = arith.constant 0 : i32
    %c0_i32_0 = arith.constant 0 : i32
    return %arg0, %c0_i32 : i32, i32
  }
}

</mosaic_0001>

<bundles_post_ra>
// kernel: tpu_custom_call.1
= control target key start
LH: loop header
LB: loop body
LE: loop exit
PB: predicated region body
PF: predicated region fallthrough
CT: control target
= control target key end

     0   :  { %9 = vsyncpa [#allocation3], 0  ;;  %s713_s0 = inlined_call_operand.vmem [shape: f32[64,4], index: 0, kind: input, shape index: {}]   ;;  %s714_s1 = inlined_call_operand.vmem [shape: f32[4,128], index: 1, kind: input, shape index: {}]   ;;  %s715_s2 = inlined_call_operand.hbm [shape: f32[2,128,128], index: 2, kind: input, shape index: {}]   ;;  %s716_s3 = inlined_call_operand.vmem [shape: f32[3,128], index: 3, kind: input, shape index: {}]   ;;  %s717_s4 = inlined_call_operand.hbm [shape: f32[64,128], index: 4, kind: output, shape index: {}]  }
   0x1   :  { %10 = vsyncpa [#allocation4], 0  ;;  %s19_s17 = sshll.u32 %s715_s2, 4  ;;  %s543_s18 = smov [#allocation2]   ;;  %s20_s17 = int_to_ptr.hbm [resolvable:$true] %s19_s17 }
   0x2   :  { %s21_s19 = sshll.u32 %s543_s18, 4  ;;  %s544_s20 = smov 128   ;;  %s22_s19 = int_to_ptr.vmem [resolvable:$true] %s21_s19 }
   0x3   :  { %s545_s21 = smov 8  }
   0x4   :  { %27 = dma.hbm_to_vmem [thread:$0]  %s20_s17, 4096, %s22_s19, [#allocation3], %s544_s20, %s544_s20, %s545_s21  }
   0x5   :  { %539 = dma.done.wait [#allocation3], 4096  }
   0x6   :  { %540 = vsyncadd [#allocation3], 4294963200  ;;  %v546_v0 = vmov 2   ;;  %v547_v1 = vmov 0   ;;  %v38_v2 = vld [vmem:[%s713_s0 + $0x20] sm:$0xff]  ;;  %v39_v3 = vld [vmem:[%s713_s0 + $0x28] sm:$0xff] }
   0x7   :  { %455 = vset.pattern.permute.xlu1 %v546_v0  ;;  %454 = vset.pattern.permute.xlu0 %v547_v1  ;;  %v34_v4 = vld [vmem:[%s713_s0] sm:$0xff]  ;;  %v548_v5 = vmov 3   ;;  %v549_v6 = vmov 1   ;;  %v40_v7 = vld [vmem:[%s713_s0 + $0x30] sm:$0xff]  ;;  %v35_v8 = vld [vmem:[%s713_s0 + $0x8] sm:$0xff]  ;;  %s401_s27 = sshll.u32 %s717_s4, 4  ;;  %s402_s27 = int_to_ptr.hbm [resolvable:$true] %s401_s27 }
   0x8   :  { %457 = vset.pattern.permute.xlu2 %v547_v1  ;;  %170 = vperm.xlu1 %455, %v38_v2   ;;  %v36_v9 = vld [vmem:[%s713_s0 + $0x10] sm:$0xff]  ;;  %v41_v10 = vld [vmem:[%s713_s0 + $0x38] sm:$0xff]  ;;  %v273_v14 = vld [vmem:[#allocation2 + $0x68] sm:$0xff] }
   0x9   :  { %66 = vperm.xlu0 %454, %v38_v2   ;;  %71 = vperm.xlu2 %457, %v39_v3   ;;  %v37_v11 = vld [vmem:[%s713_s0 + $0x18] sm:$0xff]  ;;  %v274_v13 = vld [vmem:[#allocation2 + $0x70] sm:$0xff]  ;;  %v272_v15 = vld [vmem:[#allocation2 + $0x60] sm:$0xff] }
   0xa   :  { %v275_v12 = vld [vmem:[#allocation2 + $0x78] sm:$0xff]  ;;  %v270_v17 = vld [vmem:[#allocation2 + $0x50] sm:$0xff]  ;;  %v269_v19 = vld [vmem:[#allocation2 + $0x48] sm:$0xff] }
   0xb   :  { %414 = vmatpush.msra.mxu2 %v275_v12  ;;  %278 = vmatpush.msra.mxu0 %v275_v12  ;;  %v271_v16 = vld [vmem:[#allocation2 + $0x58] sm:$0xff]  ;;  %v268_v20 = vld [vmem:[#allocation2 + $0x40] sm:$0xff]  ;;  %v266_v22 = vld [vmem:[#allocation2 + $0x30] sm:$0xff] }
   0xc   :  { %v267_v21 = vld [vmem:[#allocation2 + $0x38] sm:$0xff]  ;;  %v265_v23 = vld [vmem:[#allocation2 + $0x28] sm:$0xff]  ;;  %v264_v25 = vld [vmem:[#allocation2 + $0x20] sm:$0xff] }
   0xd   :  { %415 = vmatpush.msra.mxu2 %v274_v13  ;;  %279 = vmatpush.msra.mxu0 %v274_v13  ;;  %v263_v26 = vld [vmem:[#allocation2 + $0x18] sm:$0xff]  ;;  %v262_v27 = vld [vmem:[#allocation2 + $0x10] sm:$0xff]  ;;  %v261_v28 = vld [vmem:[#allocation2 + $0x8] sm:$0xff] }
   0xe   :  { %v260_v29 = vld [vmem:[#allocation2] sm:$0xff] }
   0xf   :  { %416 = vmatpush.msra.mxu2 %v273_v14  ;;  %280 = vmatpush.msra.mxu0 %v273_v14  ;;  %v639_v36 = vld [vmem:[%s714_s1] ss:$0 sm:$0xff]  ;;  %v651_v41 = vld [vmem:[%s714_s1 + $0x1] ss:$0 sm:$0xff]  ;;  %v656_v42 = vld [vmem:[%s714_s1 + $0x2] ss:$0 sm:$0xff] }
  0x10   :  { %456 = vset.pattern.permute.xlu1 %v548_v5  ;;  %v645_v39 = vld [vmem:[%s716_s3] ss:$0 sm:$0xff]  ;;  %v662_v46 = vld [vmem:[%s714_s1 + $0x3] ss:$0 sm:$0xff] }
  0x11   :  { %463 = vset.pattern.permute.xlu0 %v546_v0  ;;  %220 = vperm.xlu1 %456, %v38_v2  }
  0x12   :  { %154 = vperm.xlu0 %463, %v34_v4   ;;  %458 = vset.pattern.permute.xlu2 %v549_v6 }
  0x13   :  { %124 = vperm.xlu2 %458, %v39_v3   ;;  %417 = vmatpush.msra.mxu2 %v272_v15 }
  0x14   :  { %281 = vmatpush.msra.mxu0 %v272_v15 }
  0x15   :  { %418 = vmatpush.msra.mxu2 %v271_v16 }
  0x16   :  { %282 = vmatpush.msra.mxu0 %v271_v16 }
  0x17   :  { %419 = vmatpush.msra.mxu2 %v270_v17 }
  0x18   :  { %283 = vmatpush.msra.mxu0 %v270_v17 }
  0x19   :  { %459 = vset.pattern.permute.xlu1 %v547_v1  ;;  %420 = vmatpush.msra.mxu2 %v269_v19 }
  0x1a   :  { %464 = vset.pattern.permute.xlu0 %v549_v6  ;;  %46 = vperm.xlu1 %459, %v34_v4  }
  0x1b   :  { %120 = vperm.xlu0 %464, %v38_v2   ;;  %460 = vset.pattern.permute.xlu2 %v546_v0 }
  0x1c   :  { %174 = vperm.xlu2 %460, %v39_v3   ;;  %284 = vmatpush.msra.mxu0 %v269_v19 }
  0x1d   :  { %421 = vmatpush.msra.mxu2 %v268_v20 }
  0x1e   :  { %285 = vmatpush.msra.mxu0 %v268_v20 }
  0x1f   :  { %422 = vmatpush.msra.mxu2 %v267_v21 }
  0x20   :  { %286 = vmatpush.msra.mxu0 %v267_v21 }
  0x21   :  { %423 = vmatpush.msra.mxu2 %v266_v22 }
  0x22   :  { %461 = vset.pattern.permute.xlu1 %v548_v5  ;;  %287 = vmatpush.msra.mxu0 %v266_v22 }
  0x23   :  { %104 = vperm.xlu0 %464, %v34_v4   ;;  %224 = vperm.xlu1 %461, %v39_v3  }
  0x24   :  { %462 = vset.pattern.permute.xlu2 %v547_v1  ;;  %424 = vmatpush.msra.mxu2 %v265_v23 }
  0x25   :  { %76 = vperm.xlu2 %462, %v40_v7   ;;  %288 = vmatpush.msra.mxu0 %v265_v23 }
  0x26   :  { %425 = vmatpush.msra.mxu2 %v264_v25 }
  0x27   :  { %289 = vmatpush.msra.mxu0 %v264_v25 }
  0x28   :  { %426 = vmatpush.msra.mxu2 %v263_v26 }
  0x29   :  { %290 = vmatpush.msra.mxu0 %v263_v26 }
  0x2a   :  { %427 = vmatpush.msra.mxu2 %v262_v27 }
  0x2b   :  { %108 = vperm.xlu0 %464, %v35_v8   ;;  %465 = vset.pattern.permute.xlu1 %v549_v6 }
  0x2c   :  { %128 = vperm.xlu1 %465, %v40_v7   ;;  %291 = vmatpush.msra.mxu0 %v262_v27 }
  0x2d   :  { %466 = vset.pattern.permute.xlu2 %v548_v5  ;;  %428 = vmatpush.msra.mxu2 %v261_v28 }
  0x2e   :  { %204 = vperm.xlu2 %466, %v34_v4   ;;  %292 = vmatpush.msra.mxu0 %v261_v28 }
  0x2f   :  { %429 = vmatpush.msra.mxu2 %v260_v29 }
  0x30   :  { %293 = vmatpush.msra.mxu0 %v260_v29 }
  0x33   :  { %473 = vset.pattern.permute.xlu0 %v548_v5 }
  0x34   :  { %208 = vperm.xlu0 %473, %v35_v8   ;;  %467 = vset.pattern.permute.xlu1 %v547_v1 }
  0x35   :  { %51 = vperm.xlu1 %467, %v35_v8  }
  0x36   :  { %468 = vset.pattern.permute.xlu2 %v546_v0 }
  0x37   :  { %178 = vperm.xlu2 %468, %v40_v7  }
  0x3c   :  { %478 = vset.pattern.permute.xlu0 %v546_v0 }
  0x3d   :  { %162 = vperm.xlu0 %478, %v36_v9   ;;  %469 = vset.pattern.permute.xlu1 %v548_v5 }
  0x3e   :  { %228 = vperm.xlu1 %469, %v40_v7  }
  0x3f   :  { %470 = vset.pattern.permute.xlu2 %v547_v1 }
  0x40   :  { %81 = vperm.xlu2 %470, %v41_v10  }
  0x45   :  { %483 = vset.pattern.permute.xlu0 %v548_v5 }
  0x46   :  { %471 = vset.pattern.permute.xlu1 %v546_v0  ;;  %216 = vperm.xlu0 %483, %v37_v11  }
  0x47   :  { %158 = vperm.xlu1 %471, %v35_v8  }
  0x48   :  { %472 = vset.pattern.permute.xlu2 %v549_v6 }
  0x49   :  { %132 = vperm.xlu2 %472, %v41_v10  }
  0x4f   :  { %474 = vset.pattern.permute.xlu1 %v547_v1 }
  0x50   :  { %56 = vperm.xlu1 %474, %v36_v9  }
  0x51   :  { %475 = vset.pattern.permute.xlu2 %v546_v0 }
  0x52   :  { %182 = vperm.xlu2 %475, %v41_v10  }
  0x58   :  { %476 = vset.pattern.permute.xlu1 %v549_v6 }
  0x59   :  { %112 = vperm.xlu1 %476, %v36_v9  }
  0x5a   :  { %477 = vset.pattern.permute.xlu2 %v548_v5 }
  0x5b   :  { %232 = vperm.xlu2 %477, %v41_v10  }
  0x61   :  { %479 = vset.pattern.permute.xlu1 %v548_v5 }
  0x62   :  { %212 = vperm.xlu1 %479, %v36_v9  }
  0x63   :  { %v72_v18 = vpop.permute.xlu2 %71  ;;  %480 = vset.pattern.permute.xlu2 %v547_v1 }
  0x64   :  { %61 = vperm.xlu2 %480, %v37_v11   ;;  %v90_v40 = vmul.f32 %v639_v36, %v72_v18 }
  0x66   :  { %v99_v48 = vadd.f32 %v645_v39, %v90_v40 }
  0x6a   :  { %481 = vset.pattern.permute.xlu1 %v549_v6 }
  0x6b   :  { %116 = vperm.xlu1 %481, %v37_v11  }
  0x6c   :  { %482 = vset.pattern.permute.xlu2 %v546_v0 }
  0x6d   :  { %v125_v24 = vpop.permute.xlu2 %124  ;;  %166 = vperm.xlu2 %482, %v37_v11  }
  0x6e   :  { %v141_v49 = vmul.f32 %v651_v41, %v125_v24 }
  0x70   :  { %v149_v56 = vadd.f32 %v141_v49, %v99_v48 }
  0x76   :  { %v175_v30 = vpop.permute.xlu2 %174 }
  0x77   :  { %v191_v57 = vmul.f32 %v656_v42, %v175_v30 }
  0x79   :  { %v199_v2 = vadd.f32 %v191_v57, %v149_v56 }
  0x7a   :  { %v171_v31 = vpop.permute.xlu1 %170 }
  0x7b   :  { %v67_v32 = vpop.permute.xlu0 %66  ;;  %v190_v50 = vmul.f32 %v656_v42, %v171_v31 }
  0x7c   :  { %v89_v37 = vmul.f32 %v639_v36, %v67_v32 }
  0x7e   :  { %v98_v43 = vadd.f32 %v645_v39, %v89_v37 }
  0x7f   :  { %v77_v33 = vpop.permute.xlu2 %76 }
  0x80   :  { %v91_v13 = vmul.f32 %v639_v36, %v77_v33 }
  0x82   :  { %v100_v17 = vadd.f32 %v645_v39, %v91_v13  ;;  %v333_v13 = vld [vmem:[#allocation2 + $0xa8] sm:$0xff] }
  0x83   :  { %v221_v34 = vpop.permute.xlu1 %220 }
  0x84   :  { %v155_v35 = vpop.permute.xlu0 %154  ;;  %v240_v52 = vmul.f32 %v662_v46, %v221_v34 }
  0x85   :  { %v186_v60 = vmul.f32 %v656_v42, %v155_v35 }
  0x88   :  { %v205_v38 = vpop.permute.xlu2 %204 }
  0x89   :  { %v236_v3 = vmul.f32 %v662_v46, %v205_v38 }
  0x8c   :  { %v47_v45 = vpop.permute.xlu1 %46 }
  0x8d   :  { %v121_v44 = vpop.permute.xlu0 %120  ;;  %v85_v53 = vmul.f32 %v639_v36, %v47_v45 }
  0x8e   :  { %v140_v47 = vmul.f32 %v651_v41, %v121_v44 }
  0x8f   :  { %v94_v61 = vadd.f32 %v645_v39, %v85_v53  ;;  %v343_v53 = vld [vmem:[#allocation2 + $0xf8] sm:$0xff] }
  0x90   :  { %v148_v51 = vadd.f32 %v140_v47, %v98_v43  ;;  %430 = vmatpush.msra.mxu3 %v343_v53  ;;  %346 = vmatpush.msra.mxu1 %v343_v53 }
  0x91   :  { %v179_v55 = vpop.permute.xlu2 %178 }
  0x92   :  { %v198_v54 = vadd.f32 %v190_v50, %v148_v51  ;;  %v192_v21 = vmul.f32 %v656_v42, %v179_v55  ;;  %v341_v55 = vld [vmem:[#allocation2 + $0xe8] sm:$0xff] }
  0x94   :  { %v248_v58 = vadd.f32 %v240_v52, %v198_v54  ;;  %v342_v54 = vld [vmem:[#allocation2 + $0xf0] sm:$0xff] }
  0x95   :  { %v105_v59 = vpop.permute.xlu0 %104  ;;  %v225_v63 = vpop.permute.xlu1 %224  ;;  %431 = vmatpush.msra.mxu3 %v342_v54  ;;  %347 = vmatpush.msra.mxu1 %v342_v54 }
  0x96   :  { %v136_v62 = vmul.f32 %v651_v41, %v105_v59  ;;  %v256_v0 = vmax.f32 %v248_v58, 0.0  ;;  %v241_v1 = vmul.f32 %v662_v46, %v225_v63  ;;  %v340_v58 = vld [vmem:[#allocation2 + $0xe0] sm:$0xff]  ;;  %v338_v63 = vld [vmem:[#allocation2 + $0xd0] sm:$0xff] }
  0x97   :  { %432 = vmatpush.msra.mxu3 %v341_v55  ;;  %348 = vmatpush.msra.mxu1 %v341_v55  ;;  %v490_v55 = vld [vmem:[%s716_s3 + $0x2] ss:$0 sm:$0xff] }
  0x98   :  { %v144_v4 = vadd.f32 %v136_v62, %v94_v61  ;;  %306 = vmatmul.f32.vlgmr.msra.gmra.mxu2 %v256_v0  ;;  %v249_v6 = vadd.f32 %v241_v1, %v199_v2  ;;  %v339_v61 = vld [vmem:[#allocation2 + $0xd8] sm:$0xff] }
  0x99   :  { %433 = vmatpush.msra.mxu3 %v340_v58  ;;  %349 = vmatpush.msra.mxu1 %v340_v58 }
  0x9a   :  { %v194_v5 = vadd.f32 %v186_v60, %v144_v4  ;;  %v82_v7 = vpop.permute.xlu2 %81  ;;  %v257_v10 = vmax.f32 %v249_v6, 0.0 }
  0x9b   :  { %v92_v15 = vmul.f32 %v639_v36, %v82_v7  ;;  %434 = vmatpush.msra.mxu3 %v339_v61  ;;  %350 = vmatpush.msra.mxu1 %v339_v61 }
  0x9c   :  { %v244_v8 = vadd.f32 %v236_v3, %v194_v5  ;;  %v337_v3 = vld [vmem:[#allocation2 + $0xc8] sm:$0xff]  ;;  %v336_v5 = vld [vmem:[#allocation2 + $0xc0] sm:$0xff] }
  0x9d   :  { %v101_v18 = vadd.f32 %v645_v39, %v92_v15  ;;  %v109_v23 = vpop.permute.xlu0 %108  ;;  %435 = vmatpush.msra.mxu3 %v338_v63  ;;  %351 = vmatpush.msra.mxu1 %v338_v63  ;;  %v332_v15 = vld [vmem:[#allocation2 + $0xa0] sm:$0xff] }
  0x9e   :  { %v252_v9 = vmax.f32 %v244_v8, 0.0  ;;  %v129_v11 = vpop.permute.xlu1 %128  ;;  %v137_v35 = vmul.f32 %v651_v41, %v109_v23  ;;  %v335_v8 = vld [vmem:[#allocation2 + $0xb8] sm:$0xff] }
  0x9f   :  { %v142_v16 = vmul.f32 %v651_v41, %v129_v11  ;;  %436 = vmatpush.msra.mxu3 %v337_v3  ;;  %352 = vmatpush.msra.mxu1 %v337_v3 }
  0xa0   :  { %294 = vmatmul.f32.vlgmr.msra.gmra.mxu0 %v252_v9  ;;  %309 = vmatmul.f32.gmra.mxu2 %v257_v10  ;;  %v334_v10 = vld [vmem:[#allocation2 + $0xb0] sm:$0xff] }
  0xa1   :  { %v150_v22 = vadd.f32 %v142_v16, %v100_v17  ;;  %437 = vmatpush.msra.mxu3 %v336_v5  ;;  %353 = vmatpush.msra.mxu1 %v336_v5 }
  0xa3   :  { %v133_v12 = vpop.permute.xlu2 %132  ;;  %v200_v28 = vadd.f32 %v192_v21, %v150_v22  ;;  %438 = vmatpush.msra.mxu3 %v335_v8  ;;  %354 = vmatpush.msra.mxu1 %v335_v8  ;;  %v331_v21 = vld [vmem:[#allocation2 + $0x98] sm:$0xff] }
  0xa4   :  { %v143_v19 = vmul.f32 %v651_v41, %v133_v12 }
  0xa5   :  { %439 = vmatpush.msra.mxu3 %v334_v10  ;;  %355 = vmatpush.msra.mxu1 %v334_v10 }
  0xa6   :  { %v151_v24 = vadd.f32 %v143_v19, %v101_v18  ;;  %v209_v38 = vpop.permute.xlu0 %208 }
  0xa7   :  { %v52_v14 = vpop.permute.xlu1 %51  ;;  %v237_v47 = vmul.f32 %v662_v46, %v209_v38  ;;  %440 = vmatpush.msra.mxu3 %v333_v13  ;;  %356 = vmatpush.msra.mxu1 %v333_v13 }
  0xa8   :  { %v86_v29 = vmul.f32 %v639_v36, %v52_v14 }
  0xa9   :  { %441 = vmatpush.msra.mxu3 %v332_v15  ;;  %357 = vmatpush.msra.mxu1 %v332_v15 }
  0xaa   :  { %v95_v34 = vadd.f32 %v645_v39, %v86_v29 }
  0xab   :  { %442 = vmatpush.msra.mxu3 %v331_v21  ;;  %358 = vmatpush.msra.mxu1 %v331_v21 }
  0xac   :  { %v183_v20 = vpop.permute.xlu2 %182  ;;  %v145_v44 = vadd.f32 %v137_v35, %v95_v34 }
  0xad   :  { %v193_v25 = vmul.f32 %v656_v42, %v183_v20 }
  0xaf   :  { %v201_v31 = vadd.f32 %v193_v25, %v151_v24  ;;  %v163_v60 = vpop.permute.xlu0 %162 }
  0xb0   :  { %v229_v26 = vpop.permute.xlu1 %228  ;;  %v188_v1 = vmul.f32 %v656_v42, %v163_v60 }
  0xb1   :  { %v242_v27 = vmul.f32 %v662_v46, %v229_v26  ;;  %v330_v26 = vld [vmem:[#allocation2 + $0x90] sm:$0xff] }
  0xb2   :  { %443 = vmatpush.msra.mxu3 %v330_v26  ;;  %359 = vmatpush.msra.mxu1 %v330_v26 }
  0xb3   :  { %v250_v30 = vadd.f32 %v242_v27, %v200_v28 }
  0xb5   :  { %v258_v32 = vmax.f32 %v250_v30, 0.0  ;;  %v233_v33 = vpop.permute.xlu2 %232 }
  0xb6   :  { %v243_v37 = vmul.f32 %v662_v46, %v233_v33 }
  0xb7   :  { %312 = vmatmul.f32.gmra.mxu2 %v258_v32 }
  0xb8   :  { %v251_v40 = vadd.f32 %v243_v37, %v201_v31  ;;  %v217_v17 = vpop.permute.xlu0 %216 }
  0xb9   :  { %v159_v43 = vpop.permute.xlu1 %158 }
  0xba   :  { %v187_v45 = vmul.f32 %v656_v42, %v159_v43  ;;  %v259_v48 = vmax.f32 %v251_v40, 0.0 }
  0xbc   :  { %v195_v49 = vadd.f32 %v187_v45, %v145_v44 }
  0xbe   :  { %v245_v50 = vadd.f32 %v237_v47, %v195_v49  ;;  %v62_v2 = vpop.permute.xlu2 %61 }
  0xbf   :  { %315 = vmatmul.f32.gmra.mxu2 %v259_v48  ;;  %v88_v12 = vmul.f32 %v639_v36, %v62_v2 }
  0xc0   :  { %v253_v51 = vmax.f32 %v245_v50, 0.0 }
  0xc1   :  { %v97_v18 = vadd.f32 %v645_v39, %v88_v12 }
  0xc2   :  { %297 = vmatmul.f32.gmra.mxu0 %v253_v51  ;;  %v57_v52 = vpop.permute.xlu1 %56 }
  0xc3   :  { %v87_v56 = vmul.f32 %v639_v36, %v57_v52  ;;  %v239_v36 = vmul.f32 %v662_v46, %v217_v17 }
  0xc5   :  { %v96_v62 = vadd.f32 %v645_v39, %v87_v56  ;;  %v329_v39 = vld [vmem:[#allocation2 + $0x88] sm:$0xff] }
  0xc6   :  { %444 = vmatpush.msra.mxu3 %v329_v39  ;;  %360 = vmatpush.msra.mxu1 %v329_v39 }
  0xc7   :  { %v167_v14 = vpop.permute.xlu2 %166 }
  0xc8   :  { %v189_v20 = vmul.f32 %v656_v42, %v167_v14  ;;  %v489_v42 = vld [vmem:[%s716_s3 + $0x1] ss:$0 sm:$0xff]  ;;  %s550_s3 = smov [#allocation5]  }
  0xc9   :  { %s399_s24 = sshll.u32 %s550_s3, 4  ;;  %s400_s24 = int_to_ptr.vmem [resolvable:$true] %s399_s24 }
  0xcb   :  { %v113_v57 = vpop.permute.xlu1 %112 }
  0xcc   :  { %v138_v59 = vmul.f32 %v651_v41, %v113_v57 }
  0xce   :  { %v146_v0 = vadd.f32 %v138_v59, %v96_v62 }
  0xd0   :  { %v196_v6 = vadd.f32 %v188_v1, %v146_v0 }
  0xd4   :  { %v213_v4 = vpop.permute.xlu1 %212 }
  0xd5   :  { %v238_v7 = vmul.f32 %v662_v46, %v213_v4 }
  0xd7   :  { %v246_v9 = vadd.f32 %v238_v7, %v196_v6 }
  0xd9   :  { %v254_v11 = vmax.f32 %v246_v9, 0.0 }
  0xdb   :  { %300 = vmatmul.f32.gmra.mxu0 %v254_v11 }
  0xdd   :  { %v117_v16 = vpop.permute.xlu1 %116 }
  0xde   :  { %v139_v19 = vmul.f32 %v651_v41, %v117_v16  ;;  %v328_v41 = vld [vmem:[#allocation2 + $0x80] sm:$0xff] }
  0xdf   :  { %445 = vmatpush.msra.mxu3 %v328_v41  ;;  %361 = vmatpush.msra.mxu1 %v328_v41 }
  0xe0   :  { %v147_v22 = vadd.f32 %v139_v19, %v97_v18 }
  0xe2   :  { %v197_v23 = vadd.f32 %v189_v20, %v147_v22 }
  0xe4   :  { %v247_v24 = vadd.f32 %v239_v36, %v197_v23 }
  0xe6   :  { %v255_v25 = vmax.f32 %v247_v24, 0.0 }
  0xe8   :  { %303 = vmatmul.f32.gmra.mxu0 %v255_v25 }
 0x11b   :  { %v307_v46 = vpop.f32.mrf.mxu2 }
 0x11c   :  { %v308_v27 = vadd.f32 %v489_v42, %v307_v46 }
 0x11d   :  { %v295_v28 = vpop.f32.mrf.mxu0 }
 0x11e   :  { %v323_v29 = vmax.f32 %v308_v27, 0.0  ;;  %v296_v30 = vadd.f32 %v489_v42, %v295_v28 }
 0x120   :  { %v319_v31 = vmax.f32 %v296_v30, 0.0  ;;  %374 = vmatmul.f32.vlgmr.msra.gmra.mxu3 %v323_v29 }
 0x122   :  { %362 = vmatmul.f32.vlgmr.msra.gmra.mxu1 %v319_v31 }
 0x123   :  { %v310_v32 = vpop.f32.mrf.mxu2 }
 0x124   :  { %v311_v33 = vadd.f32 %v489_v42, %v310_v32 }
 0x126   :  { %v324_v34 = vmax.f32 %v311_v33, 0.0 }
 0x128   :  { %377 = vmatmul.f32.gmra.mxu3 %v324_v34 }
 0x13a   :  { %v313_v35 = vpop.f32.mrf.mxu2 }
 0x13b   :  { %v314_v37 = vadd.f32 %v489_v42, %v313_v35 }
 0x13d   :  { %v325_v38 = vmax.f32 %v314_v37, 0.0 }
 0x13f   :  { %v298_v40 = vpop.f32.mrf.mxu0  ;;  %380 = vmatmul.f32.gmra.mxu3 %v325_v38 }
 0x140   :  { %v299_v43 = vadd.f32 %v489_v42, %v298_v40 }
 0x142   :  { %v320_v44 = vmax.f32 %v299_v43, 0.0  ;;  %v316_v45 = vpop.f32.mrf.mxu2 }
 0x143   :  { %v317_v47 = vadd.f32 %v489_v42, %v316_v45 }
 0x144   :  { %365 = vmatmul.f32.gmra.mxu1 %v320_v44 }
 0x145   :  { %v326_v48 = vmax.f32 %v317_v47, 0.0 }
 0x147   :  { %383 = vmatmul.f32.gmra.mxu3 %v326_v48 }
 0x158   :  { %v301_v49 = vpop.f32.mrf.mxu0 }
 0x159   :  { %v302_v50 = vadd.f32 %v489_v42, %v301_v49 }
 0x15b   :  { %v321_v51 = vmax.f32 %v302_v50, 0.0 }
 0x15d   :  { %368 = vmatmul.f32.gmra.mxu1 %v321_v51 }
 0x165   :  { %v304_v52 = vpop.f32.mrf.mxu0 }
 0x166   :  { %v305_v53 = vadd.f32 %v489_v42, %v304_v52 }
 0x168   :  { %v322_v54 = vmax.f32 %v305_v53, 0.0 }
 0x16a   :  { %371 = vmatmul.f32.gmra.mxu1 %v322_v54 }
 0x19f   :  { %v363_v56 = vpop.f32.mrf.mxu1 }
 0x1a0   :  { %v364_v57 = vadd.f32 %v490_v55, %v363_v56 }
 0x1a2   :  { %387 = vst [vmem:[#allocation5] sm:$0xff] %v364_v57 }
 0x1a3   :  { %v375_v58 = vpop.f32.mrf.mxu3 }
 0x1a4   :  { %v376_v59 = vadd.f32 %v490_v55, %v375_v58 }
 0x1a6   :  { %391 = vst [vmem:[#allocation5 + $0x20] sm:$0xff] %v376_v59 }
 0x1ab   :  { %v378_v60 = vpop.f32.mrf.mxu3 }
 0x1ac   :  { %v379_v61 = vadd.f32 %v490_v55, %v378_v60 }
 0x1ae   :  { %392 = vst [vmem:[#allocation5 + $0x28] sm:$0xff] %v379_v61 }
 0x1c1   :  { %v366_v62 = vpop.f32.mrf.mxu1 }
 0x1c2   :  { %v367_v63 = vadd.f32 %v490_v55, %v366_v62  ;;  %v381_v0 = vpop.f32.mrf.mxu3 }
 0x1c3   :  { %v382_v1 = vadd.f32 %v490_v55, %v381_v0 }
 0x1c4   :  { %388 = vst [vmem:[#allocation5 + $0x8] sm:$0xff] %v367_v63 }
 0x1c5   :  { %393 = vst [vmem:[#allocation5 + $0x30] sm:$0xff] %v382_v1 }
 0x1ca   :  { %v384_v2 = vpop.f32.mrf.mxu3 }
 0x1cb   :  { %v385_v3 = vadd.f32 %v490_v55, %v384_v2 }
 0x1cd   :  { %394 = vst [vmem:[#allocation5 + $0x38] sm:$0xff] %v385_v3 }
 0x1da   :  { %v369_v4 = vpop.f32.mrf.mxu1 }
 0x1db   :  { %v370_v5 = vadd.f32 %v490_v55, %v369_v4 }
 0x1dd   :  { %389 = vst [vmem:[#allocation5 + $0x10] sm:$0xff] %v370_v5 }
 0x1e7   :  { %v372_v6 = vpop.f32.mrf.mxu1 }
 0x1e8   :  { %v373_v7 = vadd.f32 %v490_v55, %v372_v6 }
 0x1ea   :  { %390 = vst [vmem:[#allocation5 + $0x18] sm:$0xff] %v373_v7 }
 0x1eb   :  { %407 = dma.vmem_to_hbm [thread:$0]  %s400_s24, 1024, %s402_s27, [#allocation4], %s544_s20, %s544_s20, %s545_s21  }
 0x1ec   :  { %541 = dma.done.wait [#allocation4], 1024  }
 0x1ed   :  { %542 = vsyncadd [#allocation4], 4294966272 }
 0x1ee   :  { %412 = vsyncpa [#allocation3], 1 }
 0x1ef   :  { %413 = vsyncpa [#allocation4], 1 }

</bundles_post_ra>
